<compile_context>
chip_gen: v7x
topology: tpu7x:2x2x1
jax: 0.10.0
libtpu: 0.0.40
codegen_flags: <defaults>
</compile_context>

<pallas_src>
import functools

import jax
import jax.numpy as jnp
from jax.experimental import pallas as pl
from jax.experimental.pallas import tpu as pltpu


def mha_fused_kernel(x_ref, wqkv_ref, mask_ref, o_ref, *, num_heads, head_dim):
    # x_ref    : (B*T, d_in)        -- all batch rows, one grid step
    # wqkv_ref : (d_in, 3*H*d_out)  -- fused, pre-transposed, Q columns pre-scaled
    # mask_ref : (B*T, B*T)         -- additive mask: 0 allowed / -inf masked
    # o_ref    : (B*T, H*d_out)     -- final concatenated-head layout
    hd = num_heads * head_dim

    # One fused QKV projection for every head and every (batch, token) row.
    qkv = jnp.dot(x_ref[...], wqkv_ref[...], preferred_element_type=jnp.float32)

    mask = mask_ref[...]
    contract_last = (((1,), (1,)), ((), ()))   # q.k over the feature dim, no k.T

    ctxs = []
    for h in range(num_heads):                 # static unroll; H is compile-time
        lo = h * head_dim
        q_h = qkv[:, lo:lo + head_dim]
        k_h = qkv[:, hd + lo:hd + lo + head_dim]
        v_h = qkv[:, 2 * hd + lo:2 * hd + lo + head_dim]

        s = jax.lax.dot_general(q_h, k_h, contract_last,
                                preferred_element_type=jnp.float32) + mask

        # Numerically stable softmax. Every row has its diagonal unmasked, so
        # the row max is finite and the denominator is >= 1 (no -inf-row NaNs).
        m = jnp.max(s, axis=-1, keepdims=True)
        e = jnp.exp(s - m)
        denom = jnp.sum(e, axis=-1, keepdims=True)
        attn = e * pl.reciprocal(denom, approx=True)   # EUP slot, off the VPU

        ctxs.append(jnp.dot(attn, v_h, preferred_element_type=jnp.float32))

    # Single lane-dense slab store of the already-concatenated heads.
    o_ref[...] = jnp.concatenate(ctxs, axis=-1).astype(o_ref.dtype)


def build_mha_params(wq, wk, wv, batch_size, seq_len):
    """One-time (model-load) preparation, hoisted out of the per-call path.

    wq/wk/wv: (H, d_out, d_in) in PyTorch nn.Linear layout (y = x @ W.T).
    Returns:
      w_qkv     : (d_in, 3*H*d_out) fused weight, columns ordered
                  [Q_h0 | Q_h1 | ... | K_h0 | ... | V_h0 | ...], with the
                  1/sqrt(d_out) softmax scale folded into the Q columns.
      attn_mask : (B*T, B*T) additive f32 mask combining causal masking with
                  the batch block-diagonal structure.
    """
    H, d_out, d_in = wq.shape
    scale = float(d_out) ** -0.5

    def stack(w):  # (H, d_out, d_in) -> (d_in, H*d_out)
        return jnp.transpose(w, (2, 0, 1)).reshape(d_in, H * d_out)

    w_qkv = jnp.concatenate([stack(wq) * scale, stack(wk), stack(wv)], axis=1)

    bt = batch_size * seq_len
    idx = jnp.arange(bt)
    same_batch = (idx[:, None] // seq_len) == (idx[None, :] // seq_len)
    causal = idx[None, :] <= idx[:, None]
    attn_mask = jnp.where(jnp.logical_and(same_batch, causal),
                          0.0, -jnp.inf).astype(jnp.float32)
    return w_qkv, attn_mask


def multi_head_attention_wrapper(x, w_qkv, attn_mask, *, num_heads, head_dim):
    """x: (B, T, d_in); params from build_mha_params. Returns (B, T, H*d_out)."""
    B, T, d_in = x.shape
    hd = num_heads * head_dim
    bt = B * T

    kernel = functools.partial(mha_fused_kernel,
                               num_heads=num_heads, head_dim=head_dim)

    out2d = pl.pallas_call(
        kernel,
        out_shape=jax.ShapeDtypeStruct((bt, hd), x.dtype),
        grid=(1,),                       # single step: whole problem per review
        in_specs=[
            pl.BlockSpec((bt, d_in), lambda i: (0, 0)),
            pl.BlockSpec((d_in, 3 * hd), lambda i: (0, 0)),
            pl.BlockSpec((bt, bt), lambda i: (0, 0)),
        ],
        out_specs=pl.BlockSpec((bt, hd), lambda i: (0, 0)),
        compiler_params=pltpu.CompilerParams(
            dimension_semantics=("arbitrary",)),
    )(x.reshape(bt, d_in), w_qkv, attn_mask)

    return out2d.reshape(B, T, hd)


def reference_mha(x, wq, wk, wv):
    """Pure-JAX reference mirroring the PyTorch forward exactly."""
    B, T, d_in = x.shape
    H, d_out, _ = wq.shape
    mask = jnp.triu(jnp.ones((T, T), dtype=bool), k=1)
    outs = []
    for h in range(H):
        q = x @ wq[h].T
        k = x @ wk[h].T
        v = x @ wv[h].T
        s = q @ jnp.swapaxes(k, 1, 2)
        s = jnp.where(mask[None], -jnp.inf, s)
        w = jax.nn.softmax(s / jnp.sqrt(jnp.float32(d_out)), axis=-1)
        outs.append(w @ v)
    return jnp.concatenate(outs, axis=-1)


if __name__ == "__main__":
    # Shapes implied by the module's script: inputs (6, 3), batch=2 -> x (2, 6, 3)
    d_in, d_out, num_heads = 3, 2, 2
    inputs = jnp.array(
        [[0.43, 0.15, 0.89],
         [0.55, 0.87, 0.66],
         [0.57, 0.85, 0.64],
         [0.22, 0.58, 0.33],
         [0.77, 0.25, 0.10],
         [0.05, 0.80, 0.55]], dtype=jnp.float32)
    x = jnp.stack([inputs, inputs], axis=0)        # (2, 6, 3)
    B, T, _ = x.shape

    # Deterministic synthetic weights (nn.Linear(d_in, d_out) -> (d_out, d_in)).
    key = jax.random.PRNGKey(0)
    kq, kk, kv = jax.random.split(key, 3)
    bound = 1.0 / jnp.sqrt(jnp.float32(d_in))
    wq = jax.random.uniform(kq, (num_heads, d_out, d_in), jnp.float32, -bound, bound)
    wk = jax.random.uniform(kk, (num_heads, d_out, d_in), jnp.float32, -bound, bound)
    wv = jax.random.uniform(kv, (num_heads, d_out, d_in), jnp.float32, -bound, bound)

    # Hoisted out of the per-call path: fused weight + mask built once.
    w_qkv, attn_mask = build_mha_params(wq, wk, wv, batch_size=B, seq_len=T)

    out = multi_head_attention_wrapper(x, w_qkv, attn_mask,
                                       num_heads=num_heads, head_dim=d_out)
    out = jax.block_until_ready(out)

    ref = reference_mha(x, wq, wk, wv)
    assert out.shape == (B, T, num_heads * d_out)
    # Tolerance loosened slightly vs 1e-5 because the softmax denominator uses
    # the approximate EUP reciprocal (switch approx=False for bit-level parity).
    assert jnp.allclose(out, ref, atol=2e-3, rtol=2e-3), (
        float(jnp.max(jnp.abs(out - ref))))
    print("KERNEL_OK")
</pallas_src>

<mosaic_0001>
module attributes {stable_mosaic.version = 11 : i64} {
  func.func @mha_fused_kernel(%arg0: i32, %arg1: memref<12x3xf32, #tpu.memory_space<vmem>>, %arg2: memref<3x12xf32, #tpu.memory_space<vmem>>, %arg3: memref<12x12xf32, #tpu.memory_space<vmem>>, %arg4: memref<12x4xf32, #tpu.memory_space<vmem>>) attributes {dimension_semantics = [#tpu.dimension_semantics<arbitrary>], iteration_bounds = array<i64: 1>, scalar_prefetch = 0 : i64, scratch_operands = 0 : i64, tpu.core_type = #tpu.core_type<tc>, window_params = [{pipeline_mode = #tpu.pipeline_mode<synchronous>, transform_indices = @transform_0, window_bounds = array<i64: 12, 3>}, {pipeline_mode = #tpu.pipeline_mode<synchronous>, transform_indices = @transform_1, window_bounds = array<i64: 3, 12>}, {pipeline_mode = #tpu.pipeline_mode<synchronous>, transform_indices = @transform_2, window_bounds = array<i64: 12, 12>}, {pipeline_mode = #tpu.pipeline_mode<synchronous>, transform_indices = @transform_3, window_bounds = array<i64: 12, 4>}]} {
    %c0 = arith.constant 0 : index
    %c0_0 = arith.constant 0 : index
    %0 = vector.load %arg1[%c0, %c0_0] : memref<12x3xf32, #tpu.memory_space<vmem>>, vector<12x3xf32>
    %c0_1 = arith.constant 0 : index
    %c0_2 = arith.constant 0 : index
    %1 = vector.load %arg2[%c0_1, %c0_2] : memref<3x12xf32, #tpu.memory_space<vmem>>, vector<3x12xf32>
    %cst = arith.constant dense<0.000000e+00> : vector<12x12xf32>
    %2 = tpu.matmul %0, %1, %cst {dimension_numbers = #tpu.dot_dimension_numbers<[1], [0], [0], [1], [0, 0, 1, 1], [], []>} : vector<12x3xf32>, vector<3x12xf32>, vector<12x12xf32> -> vector<12x12xf32>
    %c0_3 = arith.constant 0 : index
    %c0_4 = arith.constant 0 : index
    %3 = vector.load %arg3[%c0_3, %c0_4] : memref<12x12xf32, #tpu.memory_space<vmem>>, vector<12x12xf32>
    %4 = vector.extract_strided_slice %2 {offsets = [0, 0], sizes = [12, 2], strides = [1, 1]} : vector<12x12xf32> to vector<12x2xf32>
    %5 = vector.extract_strided_slice %2 {offsets = [0, 4], sizes = [12, 2], strides = [1, 1]} : vector<12x12xf32> to vector<12x2xf32>
    %6 = vector.extract_strided_slice %2 {offsets = [0, 8], sizes = [12, 2], strides = [1, 1]} : vector<12x12xf32> to vector<12x2xf32>
    %cst_5 = arith.constant dense<0.000000e+00> : vector<12x12xf32>
    %7 = tpu.matmul %4, %5, %cst_5 {dimension_numbers = #tpu.dot_dimension_numbers<[1], [1], [0], [0], [0, 0, 1, 0], [], []>} : vector<12x2xf32>, vector<12x2xf32>, vector<12x12xf32> -> vector<12x12xf32>
    %8 = arith.addf %7, %3 : vector<12x12xf32>
    %cst_6 = arith.constant dense<0xFF800000> : vector<12xf32>
    %9 = vector.multi_reduction <maximumf>, %8, %cst_6 [1] : vector<12x12xf32> to vector<12xf32>
    %10 = vector.shape_cast %9 : vector<12xf32> to vector<12x1xf32>
    %11 = vector.broadcast %10 : vector<12x1xf32> to vector<12x12xf32>
    %12 = arith.subf %8, %11 : vector<12x12xf32>
    %13 = math.exp %12 : vector<12x12xf32>
    %cst_7 = arith.constant dense<0.000000e+00> : vector<12xf32>
    %14 = vector.multi_reduction <add>, %13, %cst_7 [1] : vector<12x12xf32> to vector<12xf32>
    %15 = vector.shape_cast %14 : vector<12xf32> to vector<12x1xf32>
    %16 = tpu.reciprocal %15 {approx = true} : vector<12x1xf32> -> vector<12x1xf32>
    %17 = vector.broadcast %16 : vector<12x1xf32> to vector<12x12xf32>
    %18 = arith.mulf %13, %17 : vector<12x12xf32>
    %cst_8 = arith.constant dense<0.000000e+00> : vector<12x2xf32>
    %19 = tpu.matmul %18, %6, %cst_8 {dimension_numbers = #tpu.dot_dimension_numbers<[1], [0], [0], [1], [0, 0, 1, 1], [], []>} : vector<12x12xf32>, vector<12x2xf32>, vector<12x2xf32> -> vector<12x2xf32>
    %20 = vector.extract_strided_slice %2 {offsets = [0, 2], sizes = [12, 2], strides = [1, 1]} : vector<12x12xf32> to vector<12x2xf32>
    %21 = vector.extract_strided_slice %2 {offsets = [0, 6], sizes = [12, 2], strides = [1, 1]} : vector<12x12xf32> to vector<12x2xf32>
    %22 = vector.extract_strided_slice %2 {offsets = [0, 10], sizes = [12, 2], strides = [1, 1]} : vector<12x12xf32> to vector<12x2xf32>
    %cst_9 = arith.constant dense<0.000000e+00> : vector<12x12xf32>
    %23 = tpu.matmul %20, %21, %cst_9 {dimension_numbers = #tpu.dot_dimension_numbers<[1], [1], [0], [0], [0, 0, 1, 0], [], []>} : vector<12x2xf32>, vector<12x2xf32>, vector<12x12xf32> -> vector<12x12xf32>
    %24 = arith.addf %23, %3 : vector<12x12xf32>
    %cst_10 = arith.constant dense<0xFF800000> : vector<12xf32>
    %25 = vector.multi_reduction <maximumf>, %24, %cst_10 [1] : vector<12x12xf32> to vector<12xf32>
    %26 = vector.shape_cast %25 : vector<12xf32> to vector<12x1xf32>
    %27 = vector.broadcast %26 : vector<12x1xf32> to vector<12x12xf32>
    %28 = arith.subf %24, %27 : vector<12x12xf32>
    %29 = math.exp %28 : vector<12x12xf32>
    %cst_11 = arith.constant dense<0.000000e+00> : vector<12xf32>
    %30 = vector.multi_reduction <add>, %29, %cst_11 [1] : vector<12x12xf32> to vector<12xf32>
    %31 = vector.shape_cast %30 : vector<12xf32> to vector<12x1xf32>
    %32 = tpu.reciprocal %31 {approx = true} : vector<12x1xf32> -> vector<12x1xf32>
    %33 = vector.broadcast %32 : vector<12x1xf32> to vector<12x12xf32>
    %34 = arith.mulf %29, %33 : vector<12x12xf32>
    %cst_12 = arith.constant dense<0.000000e+00> : vector<12x2xf32>
    %35 = tpu.matmul %34, %22, %cst_12 {dimension_numbers = #tpu.dot_dimension_numbers<[1], [0], [0], [1], [0, 0, 1, 1], [], []>} : vector<12x12xf32>, vector<12x2xf32>, vector<12x2xf32> -> vector<12x2xf32>
    %36 = tpu.concatenate %19, %35 in 1 : vector<12x2xf32>, vector<12x2xf32> -> vector<12x4xf32>
    %c0_13 = arith.constant 0 : index
    %c0_14 = arith.constant 0 : index
    %37 = vector.load %arg4[%c0_13, %c0_14] : memref<12x4xf32, #tpu.memory_space<vmem>>, vector<12x4xf32>
    tpu.vector_store %arg4[%c0_13, %c0_14], %36 {strides = array<i32>} : memref<12x4xf32, #tpu.memory_space<vmem>>, vector<12x4xf32>,
    return
  }
  func.func @transform_0(%arg0: i32) -> (i32, i32) {
    %c0_i32 = arith.constant 0 : i32
    %c0_i32_0 = arith.constant 0 : i32
    %c0_i32_1 = arith.constant 0 : i32
    return %c0_i32, %c0_i32_0 : i32, i32
  }
  func.func @transform_1(%arg0: i32) -> (i32, i32) {
    %c0_i32 = arith.constant 0 : i32
    %c0_i32_0 = arith.constant 0 : i32
    %c0_i32_1 = arith.constant 0 : i32
    return %c0_i32, %c0_i32_0 : i32, i32
  }
  func.func @transform_2(%arg0: i32) -> (i32, i32) {
    %c0_i32 = arith.constant 0 : i32
    %c0_i32_0 = arith.constant 0 : i32
    %c0_i32_1 = arith.constant 0 : i32
    return %c0_i32, %c0_i32_0 : i32, i32
  }
  func.func @transform_3(%arg0: i32) -> (i32, i32) {
    %c0_i32 = arith.constant 0 : i32
    %c0_i32_0 = arith.constant 0 : i32
    %c0_i32_1 = arith.constant 0 : i32
    return %c0_i32, %c0_i32_0 : i32, i32
  }
}

</mosaic_0001>

<bundles_post_ra>
// kernel: tpu_custom_call.1
= control target key start
LH: loop header
LB: loop body
LE: loop exit
PB: predicated region body
PF: predicated region fallthrough
CT: control target
= control target key end

     0   :  { %vm24_vm0 = vcmask 1042432   ;;  %vm17_vm1 = vcmask 23552   ;;  %vm111_vm2 = vcmask 15360   ;;  %vm199_vm4 = vcmask 93184   ;;  %s664_s21 = smov 120   ;;  %s665_s22 = smov 122   ;;  %s769_s1 = inlined_call_operand.vmem [shape: f32[3,12], index: 1, kind: input, shape index: {}]   ;;  %s770_s0 = inlined_call_operand.vmem [shape: f32[12,3], index: 0, kind: input, shape index: {}]   ;;  %s771_s2 = inlined_call_operand.vmem [shape: f32[12,12], index: 2, kind: input, shape index: {}]   ;;  %s772_s3 = inlined_call_operand.vmem [shape: f32[12,4], index: 3, kind: output, shape index: {}]  }
   0x1   :  { %v16_v0 = vld [vmem:[%s769_s1] sm:$0x7]  ;;  %v15_v2 = vld [vmem:[%s770_s0 + $0x8] sm:$0xf]  ;;  %s663_s1 = smov 124   ;;  %vm705_vm3 = vmpackc.low %vm111_vm2, %vm111_vm2  ;;  %vm195_vm5 = vcmask 97280  }
   0x2   :  { %v14_v1 = vld [vmem:[%s770_s0] sm:$0xff]  ;;  %563 = vmatprep.subr.msk.mxu0 %vm24_vm0, %v16_v0  ;;  %v717_v11 = vld [vmem:[%s771_s2 + $0x8] sm:$0xf]  ;;  %vm230_vm6 = vcmask 1043456   ;;  %vm667_vm7 = vmmov 1   ;;  %s668_s23 = smov 118  }
   0x3   :  { %565 = vmatprep.mubr.msk.f32.mxu0 %vm17_vm1, %v14_v1  ;;  %564 = vmatpush3.msk.msra.mxu0 %vm24_vm0, %v16_v0  ;;  %v722_v12 = vld [vmem:[%s771_s2] sm:$0xff]  ;;  %s666_s2 = smov 126   ;;  %vm730_vm8 = vmpackc.low %vm230_vm6, %vm667_vm7  ;;  %s669_s24 = smov 2   ;;  %vm521_vm9 = vcmask 27648   ;;  %vm519_vm10 = vcmask 31744  }
   0x4   :  { %566 = vmatmul.mubr.msk.f32.vlgmr.msra.gmra.mrb[0].mxu0 %vm17_vm1, %v15_v2 }
  0xd7   :  { %v567_v3 = vpop.f32.mrb[0].mxu0 }
  0xd8   :  { %v94_v4 = vpop.f32.mrb[1].mxu0 }
  0xd9   :  { %572 = vmatprep.mubr.msk.f32.mxu1 %vm111_vm2, %v94_v4  ;;  %v700_v5 = vpack.i.bf16 %v567_v3, %v94_v4 }
  0xdb   :  { %628 = vrot.lane.b32.xlu0 %v700_v5, %s663_s1 }
 0x14d   :  { %v629_v6 = vpop.permute.xlu0 %628 }
 0x14e   :  { %v631_v7 = vunpack.i.h.bf16 %v629_v6  ;;  %v630_v8 = vunpack.i.l.bf16 %v629_v6 }
 0x150   :  { %v596_v10 = vpack.c.bf16 %v631_v7, %v630_v8 }
 0x152   :  { %598 = vmatprep.subr.msk.bf16.mxu1 %vm705_vm3, %v596_v10 }
 0x153   :  { %601 = vmatpush3.bf16.xpose.msk.msra.mxu1 %vm705_vm3, %v596_v10 }
 0x15a   :  { %573 = vmatmul.mubr.msk.f32.vlgmr.msra.gmra.mrb[0].mxu1 %vm111_vm2, %v567_v3 }
 0x22d   :  { %v574_v13 = vpop.f32.mrb[0].mxu1 }
 0x22e   :  { %v192_v14 = vadd.f32 %v574_v13, %v717_v11  ;;  %v186_v15 = vpop.f32.mrb[1].mxu1 }
 0x22f   :  { %v187_v16 = vadd.f32 %v186_v15, %v722_v12 }
 0x230   :  { %v200_v17 = vsel %vm199_vm4, %v192_v14, -inf }
 0x231   :  { %201 = vmax.xlane.f32.xlu1 %v200_v17  ;;  %v196_v18 = vsel %vm195_vm5, %v187_v16, -inf }
 0x232   :  { %197 = vmax.xlane.f32.xlu0 %v196_v18 }
 0x242   :  { %633 = vrot.lane.b32.xlu1 %v700_v5, %s664_s21 }
 0x246   :  { %638 = vrot.lane.b32.xlu1 %v700_v5, %s665_s22 }
 0x248   :  { %310 = vrot.lane.b32.xlu0 %v567_v3, %s666_s2 }
 0x2be   :  { %v202_v19 = vpop.xlane.xlu1 %201 }
 0x2bf   :  { %v204_v20 = vsub.f32 %v192_v14, %v202_v19  ;;  %v198_v21 = vpop.xlane.xlu0 %197 }
 0x2c0   :  { %v203_v22 = vsub.f32 %v187_v16, %v198_v21 }
 0x2c1   :  { %v207_v23 = vmul.f32 1.442695, %v204_v20 }
 0x2c2   :  { %v205_v24 = vmul.f32 1.442695, %v203_v22  ;;  %v634_v25 = vpop.permute.xlu1 %633 }
 0x2c3   :  { %647 = vpow2.f32 %v207_v23  ;;  %v636_v26 = vunpack.i.h.bf16 %v634_v25  ;;  %v635_v27 = vunpack.i.l.bf16 %v634_v25  ;;  %v311_v45 = vpop.permute.xlu0 %310 }
 0x2c4   :  { %649 = vpow2.f32 %v205_v24 }
 0x2c5   :  { %v602_v29 = vpack.c.bf16 %v636_v26, %v635_v27 }
 0x2c6   :  { %v639_v30 = vpop.permute.xlu1 %638 }
 0x2c7   :  { %v641_v31 = vunpack.i.h.bf16 %v639_v30  ;;  %v640_v32 = vunpack.i.l.bf16 %v639_v30  ;;  %604 = vmatprep.subr.msk.bf16.mxu0 %vm730_vm8, %v602_v29 }
 0x2c8   :  { %607 = vmatpush3.bf16.msk.msra.mxu0 %vm730_vm8, %v602_v29 }
 0x2c9   :  { %v608_v33 = vpack.c.bf16 %v641_v31, %v640_v32 }
 0x2cb   :  { %610 = vmatprep.subr.msk.bf16.mxu0 %vm705_vm3, %v608_v33 }
 0x2cd   :  { %v648_v34 = vpop.eup %647 }
 0x2ce   :  { %v212_v35 = vsel %vm199_vm4, %v648_v34, 0.0  ;;  %v650_v36 = vpop.eup %649 }
 0x2cf   :  { %213 = vadd.xlane.f32.xlu1 %v212_v35  ;;  %v209_v37 = vsel %vm195_vm5, %v650_v36, 0.0 }
 0x2d3   :  { %210 = vadd.xlane.f32.xlu1 %v209_v37 }
 0x2e4   :  { %308 = vrot.lane.b32.xlu1 %v94_v4, %s666_s2 }
 0x35c   :  { %v214_v38 = vpop.xlane.xlu1 %213 }
 0x35d   :  { %651 = vrcp.f32 %v214_v38 }
 0x360   :  { %v211_v39 = vpop.xlane.xlu1 %210 }
 0x361   :  { %653 = vrcp.f32 %v211_v39 }
 0x364   :  { %v309_v44 = vpop.permute.xlu1 %308 }
 0x367   :  { %v652_v40 = vpop.eup %651 }
 0x368   :  { %v218_v43 = vmul.f32 %v652_v40, %v648_v34 }
 0x36b   :  { %v654_v41 = vpop.eup %653 }
 0x36c   :  { %v217_v42 = vmul.f32 %v654_v41, %v650_v36 }
 0x36e   :  { %579 = vmatprep.mubr.msk.f32.mxu0 %vm195_vm5, %v217_v42 }
 0x36f   :  { %580 = vmatmul.mubr.msk.f32.vlgmr.msra.gmra.mrb[2].mxu0 %vm195_vm5, %v218_v43 }
 0x370   :  { %613 = vmatpush3.bf16.xpose.msk.msra.mxu0 %vm705_vm3, %v608_v33  ;;  %586 = vmatprep.mubr.msk.f32.mxu0 %vm111_vm2, %v309_v44 }
 0x377   :  { %587 = vmatmul.mubr.msk.f32.vlgmr.msra.gmra.mrb[4].mxu0 %vm111_vm2, %v311_v45 }
 0x442   :  { %v581_v46 = vpop.f32.mrb[2].mxu0 }
 0x443   :  { %v299_v47 = vpop.f32.mrb[3].mxu0 }
 0x44a   :  { %v588_v48 = vpop.f32.mrb[4].mxu0 }
 0x44b   :  { %v396_v49 = vadd.f32 %v588_v48, %v717_v11  ;;  %v390_v50 = vpop.f32.mrb[5].mxu0 }
 0x44c   :  { %v391_v51 = vadd.f32 %v390_v50, %v722_v12 }
 0x44d   :  { %v402_v52 = vsel %vm199_vm4, %v396_v49, -inf }
 0x44e   :  { %403 = vmax.xlane.f32.xlu0 %v402_v52  ;;  %v399_v53 = vsel %vm195_vm5, %v391_v51, -inf }
 0x44f   :  { %400 = vmax.xlane.f32.xlu1 %v399_v53 }
 0x4db   :  { %v404_v54 = vpop.xlane.xlu0 %403 }
 0x4dc   :  { %v406_v55 = vsub.f32 %v396_v49, %v404_v54  ;;  %v401_v56 = vpop.xlane.xlu1 %400 }
 0x4dd   :  { %v405_v57 = vsub.f32 %v391_v51, %v401_v56 }
 0x4de   :  { %v409_v58 = vmul.f32 1.442695, %v406_v55 }
 0x4df   :  { %v407_v59 = vmul.f32 1.442695, %v405_v57 }
 0x4e0   :  { %655 = vpow2.f32 %v409_v58 }
 0x4e1   :  { %657 = vpow2.f32 %v407_v59 }
 0x4ea   :  { %v656_v60 = vpop.eup %655 }
 0x4eb   :  { %v414_v61 = vsel %vm199_vm4, %v656_v60, 0.0  ;;  %v658_v62 = vpop.eup %657 }
 0x4ec   :  { %415 = vadd.xlane.f32.xlu1 %v414_v61  ;;  %v411_v63 = vsel %vm195_vm5, %v658_v62, 0.0 }
 0x4f0   :  { %412 = vadd.xlane.f32.xlu1 %v411_v63 }
 0x501   :  { %643 = vrot.lane.b32.xlu1 %v700_v5, %s668_s23 }
 0x579   :  { %v416_v0 = vpop.xlane.xlu1 %415 }
 0x57a   :  { %659 = vrcp.f32 %v416_v0 }
 0x57d   :  { %v413_v1 = vpop.xlane.xlu1 %412 }
 0x57e   :  { %661 = vrcp.f32 %v413_v1 }
 0x581   :  { %v644_v2 = vpop.permute.xlu1 %643 }
 0x582   :  { %v646_v3 = vunpack.i.h.bf16 %v644_v2  ;;  %v645_v4 = vunpack.i.l.bf16 %v644_v2 }
 0x584   :  { %v614_v6 = vpack.c.bf16 %v646_v3, %v645_v4  ;;  %v660_v7 = vpop.eup %659 }
 0x585   :  { %v420_v10 = vmul.f32 %v660_v7, %v656_v60 }
 0x586   :  { %616 = vmatprep.subr.msk.bf16.mxu1 %vm730_vm8, %v614_v6 }
 0x587   :  { %619 = vmatpush3.bf16.msk.msra.mxu1 %vm730_vm8, %v614_v6 }
 0x588   :  { %v662_v8 = vpop.eup %661 }
 0x589   :  { %v419_v9 = vmul.f32 %v662_v8, %v658_v62 }
 0x58b   :  { %593 = vmatprep.mubr.msk.f32.mxu1 %vm195_vm5, %v419_v9 }
 0x58c   :  { %594 = vmatmul.mubr.msk.f32.vlgmr.msra.gmra.mrb[2].mxu1 %vm195_vm5, %v420_v10 }
 0x65f   :  { %v595_v5 = vpop.f32.mrb[2].mxu1 }
 0x660   :  { %513 = vrot.lane.b32.xlu1 %v595_v5, %s669_s24  ;;  %v500_v11 = vpop.f32.mrb[3].mxu1 }
 0x661   :  { %511 = vrot.lane.b32.xlu0 %v500_v11, %s669_s24 }
 0x6d2   :  { %v514_v12 = vpop.permute.xlu1 %513 }
 0x6d3   :  { %v518_v13 = vsel %vm111_vm2, %v581_v46, %v514_v12  ;;  %v512_v14 = vpop.permute.xlu0 %511 }
 0x6d4   :  { %522 = vst.msk [vmem:[%s772_s3 + $0x8] sm:$0xf] %vm521_vm9, %v518_v13  ;;  %v517_v15 = vsel %vm111_vm2, %v299_v47, %v512_v14 }
 0x6d5   :  { %520 = vst.msk [vmem:[%s772_s3] sm:$0xff] %vm519_vm10, %v517_v15 }

</bundles_post_ra>
